<compile_context>
chip_gen: v7x
topology: tpu7x:2x2x1
jax: 0.10.0
libtpu: 0.0.40
codegen_flags: <defaults>
</compile_context>

<pallas_src>
import functools

import jax
import jax.numpy as jnp
from jax.experimental import pallas as pl
from jax.experimental.pallas import tpu as pltpu

_BN_EPS = 1e-5          # nn.BatchNorm2d default
_LEAKY_SLOPE = 0.2      # nn.LeakyReLU(0.2)


def _same_block_kernel(x_ref, w_ref, shift_ref, o_ref, *, kh, pad, slope):
    """One grid step = one batch image.

    x_ref:     (1, H, W*Cin)        lane-packed NHWC rows (unpadded)
    w_ref:     (kh, W*Cin, W*Cout)  width-unrolled conv weight, BN scale folded
    shift_ref: (1, W*Cout)          folded conv bias + BN shift
    o_ref:     (1, H, W*Cout)       lane-packed NHWC output rows (lane-dense)
    """
    x = x_ref[0]                                   # (H, W*Cin), f32
    h, wc = x.shape
    zdt = x.dtype

    acc = None
    for r in range(kh):                            # kh row-shifted matmuls
        off = r - pad                              # xs[i] = x[i + off], zero outside
        if off == 0:
            xs = x
        elif off < 0:
            xs = jnp.concatenate(
                [jnp.zeros((-off, wc), zdt), x[: h + off, :]], axis=0)
        else:
            xs = jnp.concatenate(
                [x[off:, :], jnp.zeros((off, wc), zdt)], axis=0)
        t = jnp.dot(xs, w_ref[r], preferred_element_type=jnp.float32)
        acc = t if acc is None else acc + t

    y = acc + shift_ref[...]                       # (H, W*Cout) + (1, W*Cout)
    o_ref[0] = jnp.where(y > 0, y, slope * y).astype(o_ref.dtype)


@jax.jit
def same_block_2d(x_nchw, weight, bias, gamma, beta, running_mean, running_var):
    """Forward pass of SameBlock2d (eval-mode BatchNorm).

    x_nchw: (N, Cin, H, W) f32, weight: (Cout, Cin, KH, KW) f32 (PyTorch layouts).
    Returns (N, Cout, H, W) f32.
    """
    n, cin, h, w = x_nchw.shape
    cout, _, kh, kw = weight.shape
    assert kh == kw and kh % 2 == 1, "square odd kernel expected"
    pad = (kh - 1) // 2           # 'same' padding, as in SameBlock2d defaults
    # TODO(synk): eval-mode BatchNorm only (running stats); training-mode batch
    #             statistics would need an extra reduction pass.

    f32 = jnp.float32
    # --- lane-packed activations: (N, H, W*Cin). Single fused copy under jit. ---
    x_rows = jnp.transpose(x_nchw, (0, 2, 3, 1)).reshape(n, h, w * cin).astype(f32)

    # --- fold BatchNorm + conv bias into per-output-channel scale/shift ---
    scale = (gamma / jnp.sqrt(running_var + _BN_EPS)).astype(f32)       # (Cout,)
    shift = ((bias - running_mean) * scale + beta).astype(f32)          # (Cout,)

    # --- width-unrolled structured weight: (kh, W*Cin, W*Cout)
    #     bigw[r, wi*Cin+ci, wo*Cout+co] = weight[co, ci, r, wi-wo+pad] * scale[co]
    #     (zero where the kernel column falls outside [0, kw), i.e. horizontal
    #      zero-padding is folded in). Sized for small channel counts; for
    #      Cin/Cout >= 128 switch to a channel-on-lane tiling instead.
    w_hwio = jnp.transpose(weight, (2, 3, 1, 0)).astype(f32)            # (kh,kw,Cin,Cout)
    wi = jnp.arange(w)[:, None]                                         # input col
    wo = jnp.arange(w)[None, :]                                         # output col
    s = wi - wo + pad                                                   # kernel col
    valid = ((s >= 0) & (s < kw)).astype(f32)                           # (W, W)
    sel = w_hwio[:, jnp.clip(s, 0, kw - 1), :, :]                       # (kh,W,W,Cin,Cout)
    sel = sel * valid[None, :, :, None, None] * scale[None, None, None, None, :]
    bigw = jnp.transpose(sel, (0, 1, 3, 2, 4)).reshape(kh, w * cin, w * cout)
    shift_packed = jnp.tile(shift, w).reshape(1, w * cout)              # (1, W*Cout)

    kernel = functools.partial(_same_block_kernel, kh=kh, pad=pad,
                               slope=_LEAKY_SLOPE)

    # grid=(N,): a whole (small) image per step amortizes the ~0.35us per-step
    # overhead; weights/shift stay VMEM-resident across steps.
    # TODO(synk): for large H*W*C, tile H (with halo) and Cout to bound VMEM
    #             (32 MiB scoped default on v7x/v6e) and deepen the pipeline.
    out_rows = pl.pallas_call(
        kernel,
        out_shape=jax.ShapeDtypeStruct((n, h, w * cout), f32),
        grid_spec=pltpu.PrefetchScalarGridSpec(
            num_scalar_prefetch=0,
            grid=(n,),
            in_specs=[
                pl.BlockSpec((1, h, w * cin), lambda b: (b, 0, 0)),
                pl.BlockSpec((kh, w * cin, w * cout), lambda b: (0, 0, 0)),
                pl.BlockSpec((1, w * cout), lambda b: (0, 0)),
            ],
            out_specs=pl.BlockSpec((1, h, w * cout), lambda b: (b, 0, 0)),
        ),
        compiler_params=pltpu.CompilerParams(
            dimension_semantics=("parallel",)),
    )(x_rows, bigw, shift_packed)

    # --- unpack to NCHW (PyTorch parity). Single fused copy under jit; for an
    #     NHWC end-to-end model both boundary transposes would be dropped. ---
    return jnp.transpose(out_rows.reshape(n, h, w, cout), (0, 3, 1, 2))


def _reference(x_nchw, weight, bias, gamma, beta, running_mean, running_var,
               eps=_BN_EPS, negative_slope=_LEAKY_SLOPE):
    """Pure-JAX reference (mirrors the PyTorch module in eval mode)."""
    y = jax.lax.conv_general_dilated(
        x_nchw, weight, window_strides=(1, 1), padding="SAME",
        dimension_numbers=("NCHW", "OIHW", "NCHW"))
    y = y + bias.reshape(1, -1, 1, 1)
    y = (y - running_mean.reshape(1, -1, 1, 1)) / jnp.sqrt(
        running_var.reshape(1, -1, 1, 1) + eps)
    y = y * gamma.reshape(1, -1, 1, 1) + beta.reshape(1, -1, 1, 1)
    return jnp.where(y > 0, y, negative_slope * y)


if __name__ == "__main__":
    key = jax.random.PRNGKey(0)
    k_x, k_w, k_b, k_g, k_be, k_m, k_v = jax.random.split(key, 7)

    N, CIN, COUT, H, W, K = 2, 4, 8, 16, 16, 3

    x = jax.random.normal(k_x, (N, CIN, H, W), dtype=jnp.float32)
    weight = jax.random.normal(k_w, (COUT, CIN, K, K), dtype=jnp.float32) * 0.1
    bias = jax.random.normal(k_b, (COUT,), dtype=jnp.float32) * 0.1
    gamma = 1.0 + 0.1 * jax.random.normal(k_g, (COUT,), dtype=jnp.float32)
    beta = 0.1 * jax.random.normal(k_be, (COUT,), dtype=jnp.float32)
    running_mean = 0.1 * jax.random.normal(k_m, (COUT,), dtype=jnp.float32)
    running_var = jnp.abs(jax.random.normal(k_v, (COUT,), dtype=jnp.float32)) + 0.5

    out = same_block_2d(x, weight, bias, gamma, beta, running_mean, running_var)
    out = jax.block_until_ready(out)

    ref = _reference(x, weight, bias, gamma, beta, running_mean, running_var)
    assert out.shape == (N, COUT, H, W)
    err = float(jnp.max(jnp.abs(out - ref)))
    assert jnp.allclose(out, ref, atol=1e-4, rtol=1e-4), f"max abs err {err}"

    print("KERNEL_OK")
</pallas_src>

<mosaic_0001>
module attributes {stable_mosaic.version = 11 : i64} {
  func.func @_same_block_kernel(%arg0: i32, %arg1: memref<1x16x64xf32, #tpu.memory_space<vmem>>, %arg2: memref<3x64x128xf32, #tpu.memory_space<vmem>>, %arg3: memref<1x128xf32, #tpu.memory_space<vmem>>, %arg4: memref<1x16x128xf32, #tpu.memory_space<vmem>>) attributes {dimension_semantics = [#tpu.dimension_semantics<parallel>], iteration_bounds = array<i64: 2>, scalar_prefetch = 0 : i64, scratch_operands = 0 : i64, tpu.core_type = #tpu.core_type<tc>, window_params = [{transform_indices = @transform_0, window_bounds = array<i64: 1, 16, 64>}, {pipeline_mode = #tpu.pipeline_mode<synchronous>, transform_indices = @transform_1, window_bounds = array<i64: 3, 64, 128>}, {pipeline_mode = #tpu.pipeline_mode<synchronous>, transform_indices = @transform_2, window_bounds = array<i64: 1, 128>}, {transform_indices = @transform_3, window_bounds = array<i64: 1, 16, 128>}]} {
    %c0 = arith.constant 0 : index
    %c0_0 = arith.constant 0 : index
    %c0_1 = arith.constant 0 : index
    %0 = vector.load %arg1[%c0, %c0_0, %c0_1] : memref<1x16x64xf32, #tpu.memory_space<vmem>>, vector<1x16x64xf32>
    %1 = vector.shape_cast %0 : vector<1x16x64xf32> to vector<16x64xf32>
    %cst = arith.constant 0.000000e+00 : f32
    %2 = vector.broadcast %cst : f32 to vector<1x64xf32>
    %3 = vector.extract_strided_slice %1 {offsets = [0, 0], sizes = [15, 64], strides = [1, 1]} : vector<16x64xf32> to vector<15x64xf32>
    %4 = tpu.concatenate %2, %3 in 0 : vector<1x64xf32>, vector<15x64xf32> -> vector<16x64xf32>
    %c0_2 = arith.constant 0 : index
    %c0_3 = arith.constant 0 : index
    %c0_4 = arith.constant 0 : index
    %5 = vector.load %arg2[%c0_2, %c0_3, %c0_4] : memref<3x64x128xf32, #tpu.memory_space<vmem>>, vector<1x64x128xf32>
    %6 = vector.shape_cast %5 : vector<1x64x128xf32> to vector<64x128xf32>
    %cst_5 = arith.constant dense<0.000000e+00> : vector<16x128xf32>
    %7 = tpu.matmul %4, %6, %cst_5 {dimension_numbers = #tpu.dot_dimension_numbers<[1], [0], [0], [1], [0, 0, 1, 1], [], []>} : vector<16x64xf32>, vector<64x128xf32>, vector<16x128xf32> -> vector<16x128xf32>
    %c1 = arith.constant 1 : index
    %c0_6 = arith.constant 0 : index
    %c0_7 = arith.constant 0 : index
    %8 = vector.load %arg2[%c1, %c0_6, %c0_7] : memref<3x64x128xf32, #tpu.memory_space<vmem>>, vector<1x64x128xf32>
    %9 = vector.shape_cast %8 : vector<1x64x128xf32> to vector<64x128xf32>
    %cst_8 = arith.constant dense<0.000000e+00> : vector<16x128xf32>
    %10 = tpu.matmul %1, %9, %cst_8 {dimension_numbers = #tpu.dot_dimension_numbers<[1], [0], [0], [1], [0, 0, 1, 1], [], []>} : vector<16x64xf32>, vector<64x128xf32>, vector<16x128xf32> -> vector<16x128xf32>
    %11 = arith.addf %7, %10 : vector<16x128xf32>
    %12 = vector.extract_strided_slice %1 {offsets = [1, 0], sizes = [15, 64], strides = [1, 1]} : vector<16x64xf32> to vector<15x64xf32>
    %cst_9 = arith.constant 0.000000e+00 : f32
    %13 = vector.broadcast %cst_9 : f32 to vector<1x64xf32>
    %14 = tpu.concatenate %12, %13 in 0 : vector<15x64xf32>, vector<1x64xf32> -> vector<16x64xf32>
    %c2 = arith.constant 2 : index
    %c0_10 = arith.constant 0 : index
    %c0_11 = arith.constant 0 : index
    %15 = vector.load %arg2[%c2, %c0_10, %c0_11] : memref<3x64x128xf32, #tpu.memory_space<vmem>>, vector<1x64x128xf32>
    %16 = vector.shape_cast %15 : vector<1x64x128xf32> to vector<64x128xf32>
    %cst_12 = arith.constant dense<0.000000e+00> : vector<16x128xf32>
    %17 = tpu.matmul %14, %16, %cst_12 {dimension_numbers = #tpu.dot_dimension_numbers<[1], [0], [0], [1], [0, 0, 1, 1], [], []>} : vector<16x64xf32>, vector<64x128xf32>, vector<16x128xf32> -> vector<16x128xf32>
    %18 = arith.addf %11, %17 : vector<16x128xf32>
    %c0_13 = arith.constant 0 : index
    %c0_14 = arith.constant 0 : index
    %19 = vector.load %arg3[%c0_13, %c0_14] : memref<1x128xf32, #tpu.memory_space<vmem>>, vector<1x128xf32>
    %20 = vector.broadcast %19 : vector<1x128xf32> to vector<16x128xf32>
    %21 = arith.addf %18, %20 : vector<16x128xf32>
    %cst_15 = arith.constant 0.000000e+00 : f32
    %22 = vector.broadcast %cst_15 : f32 to vector<16x128xf32>
    %23 = arith.cmpf ogt, %21, %22 : vector<16x128xf32>
    %cst_16 = arith.constant 2.000000e-01 : f32
    %24 = vector.broadcast %cst_16 : f32 to vector<16x128xf32>
    %25 = arith.mulf %24, %21 : vector<16x128xf32>
    %26 = arith.select %23, %21, %25 : vector<16x128xi1>, vector<16x128xf32>
    %c0_17 = arith.constant 0 : index
    %c0_18 = arith.constant 0 : index
    %c0_19 = arith.constant 0 : index
    %27 = vector.load %arg4[%c0_17, %c0_18, %c0_19] : memref<1x16x128xf32, #tpu.memory_space<vmem>>, vector<1x16x128xf32>
    %28 = vector.shape_cast %27 : vector<1x16x128xf32> to vector<16x128xf32>
    %29 = vector.shape_cast %26 : vector<16x128xf32> to vector<1x16x128xf32>
    tpu.vector_store %arg4[%c0_17, %c0_18, %c0_19], %29 {strides = array<i32>} : memref<1x16x128xf32, #tpu.memory_space<vmem>>, vector<1x16x128xf32>,
    return
  }
  func.func @transform_0(%arg0: i32) -> (i32, i32, i32) {
    %c0_i32 = arith.constant 0 : i32
    %c0_i32_0 = arith.constant 0 : i32
    %c0_i32_1 = arith.constant 0 : i32
    return %arg0, %c0_i32, %c0_i32_0 : i32, i32, i32
  }
  func.func @transform_1(%arg0: i32) -> (i32, i32, i32) {
    %c0_i32 = arith.constant 0 : i32
    %c0_i32_0 = arith.constant 0 : i32
    %c0_i32_1 = arith.constant 0 : i32
    %c0_i32_2 = arith.constant 0 : i32
    return %c0_i32, %c0_i32_0, %c0_i32_1 : i32, i32, i32
  }
  func.func @transform_2(%arg0: i32) -> (i32, i32) {
    %c0_i32 = arith.constant 0 : i32
    %c0_i32_0 = arith.constant 0 : i32
    %c0_i32_1 = arith.constant 0 : i32
    return %c0_i32, %c0_i32_0 : i32, i32
  }
  func.func @transform_3(%arg0: i32) -> (i32, i32, i32) {
    %c0_i32 = arith.constant 0 : i32
    %c0_i32_0 = arith.constant 0 : i32
    %c0_i32_1 = arith.constant 0 : i32
    return %arg0, %c0_i32, %c0_i32_0 : i32, i32, i32
  }
}

</mosaic_0001>

<bundles_post_ra>
// kernel: tile.8
= control target key start
LH: loop header
LB: loop body
LE: loop exit
PB: predicated region body
PF: predicated region fallthrough
CT: control target
= control target key end

     0   :  { %s28_s0 = inlined_call_operand.vmem [shape: f32[8], index: 0, kind: input, shape index: {}]   ;;  %s29_s1 = inlined_call_operand.vmem [shape: f32[16,8], index: 1, kind: output, shape index: {}]  }
   0x1   :  { %v4_v0 = vld [vmem:[%s28_s0] ss:$0 sm:$0xff] }
   0x2   :  { %5 = vst [vmem:[%s29_s1] sm:$0xff] %v4_v0  ;;  %8 = vst [vmem:[%s29_s1 + $0x8] sm:$0xff] %v4_v0 }

// kernel: tile.9
= control target key start
LH: loop header
LB: loop body
LE: loop exit
PB: predicated region body
PF: predicated region fallthrough
CT: control target
= control target key end

     0   :  { %s131_s10 = smov 120   ;;  %s132_s11 = smov 104   ;;  %vm3_vm0 = vcmask 64512   ;;  %vm9_vm1 = vcmask 1048512   ;;  %vm15_vm2 = vcmask 982912   ;;  %vm21_vm3 = vcmask 917312   ;;  %s207_s0 = inlined_call_operand.vmem [shape: f32[16,8], index: 0, kind: input, shape index: {}]   ;;  %s208_s1 = inlined_call_operand.vmem [shape: f32[1,128], index: 1, kind: output, shape index: {}]  }
   0x1   :  { %v101_v0 = vld [vmem:[%s207_s0 + $0xf] sm:$0x1]   ;;  %v103_v1 = vld [vmem:[%s207_s0 + $0xd] sm:$0x1]   ;;  %v102_v2 = vld [vmem:[%s207_s0 + $0xe] sm:$0x1]  }
   0x2   :  { %7 = vrot.lane.b32.xlu0 %v101_v0, %s131_s10  ;;  %19 = vrot.lane.b32.xlu1 %v103_v1, %s132_s11  ;;  %v104_v3 = vld [vmem:[%s207_s0 + $0xc] sm:$0x1]   ;;  %s133_s16 = smov 112   ;;  %s134_s17 = smov 96   ;;  %v105_v4 = vld [vmem:[%s207_s0 + $0xb] sm:$0x1]  }
   0x3   :  { %v106_v5 = vld [vmem:[%s207_s0 + $0xa] sm:$0x1]   ;;  %v2_v6 = vld [vmem:[%s207_s0] sm:$0x1]   ;;  %s135_s24 = smov 88   ;;  %s136_s25 = smov 80  }
   0x4   :  { %4 = vst.msk [vmem:[#allocation0] sm:$0x1] %vm3_vm0, %v2_v6   ;;  %v107_v7 = vld [vmem:[%s207_s0 + $0x9] sm:$0x1]   ;;  %v108_v8 = vld [vmem:[%s207_s0 + $0x8] sm:$0x1]  }
   0x5   :  { %s137_s30 = smov 72   ;;  %s138_s2 = smov 64   ;;  %v109_v9 = vld [vmem:[%s207_s0 + $0x7] sm:$0x1]   ;;  %v110_v10 = vld [vmem:[%s207_s0 + $0x6] sm:$0x1]  }
   0x6   :  { %13 = vrot.lane.b32.xlu0 %v102_v2, %s133_s16  ;;  %25 = vrot.lane.b32.xlu1 %v104_v3, %s134_s17  ;;  %s139_s7 = smov 56   ;;  %s140_s8 = smov 48   ;;  %v111_v11 = vld [vmem:[%s207_s0 + $0x5] sm:$0x1]   ;;  %v112_v12 = vld [vmem:[%s207_s0 + $0x4] sm:$0x1]  }
   0x7   :  { %s141_s13 = smov 40   ;;  %s142_s14 = smov 32   ;;  %v113_v13 = vld [vmem:[%s207_s0 + $0x3] sm:$0x1]   ;;  %v114_v14 = vld [vmem:[%s207_s0 + $0x2] sm:$0x1]  }
   0x8   :  { %s143_s19 = smov 24   ;;  %s144_s20 = smov 16   ;;  %v115_v15 = vld [vmem:[%s207_s0 + $0x1] sm:$0x1]   ;;  %vm27_vm4 = vcmask 851712   ;;  %vm33_vm5 = vcmask 786112  }
   0x9   :  { %s145_s0 = smov 8   ;;  %vm39_vm6 = vcmask 720512   ;;  %vm45_vm7 = vcmask 654912   ;;  %vm51_vm8 = vcmask 589312   ;;  %vm57_vm9 = vcmask 523712  }
   0xa   :  { %31 = vrot.lane.b32.xlu0 %v105_v4, %s135_s24  ;;  %37 = vrot.lane.b32.xlu1 %v106_v5, %s136_s25  ;;  %vm63_vm10 = vcmask 458112   ;;  %vm69_vm11 = vcmask 392512   ;;  %vm75_vm12 = vcmask 326912   ;;  %vm81_vm13 = vcmask 261312  }
   0xb   :  { %vm87_vm14 = vcmask 195712   ;;  %vm93_vm15 = vcmask 130112  }
   0xe   :  { %43 = vrot.lane.b32.xlu0 %v107_v7, %s137_s30  ;;  %49 = vrot.lane.b32.xlu1 %v108_v8, %s138_s2 }
  0x12   :  { %55 = vrot.lane.b32.xlu0 %v109_v9, %s139_s7  ;;  %61 = vrot.lane.b32.xlu1 %v110_v10, %s140_s8 }
  0x16   :  { %67 = vrot.lane.b32.xlu0 %v111_v11, %s141_s13  ;;  %73 = vrot.lane.b32.xlu1 %v112_v12, %s142_s14 }
  0x1a   :  { %79 = vrot.lane.b32.xlu0 %v113_v13, %s143_s19  ;;  %85 = vrot.lane.b32.xlu1 %v114_v14, %s144_s20 }
  0x1e   :  { %91 = vrot.lane.b32.xlu0 %v115_v15, %s145_s0 }
  0x74   :  { %v8_v16 = vpop.permute.xlu0 %7   ;;  %v20_v17 = vpop.permute.xlu1 %19  }
  0x75   :  { %10 = vst.msk [vmem:[#allocation0] sm:$0x1] %vm9_vm1, %v8_v16  }
  0x78   :  { %v14_v18 = vpop.permute.xlu0 %13   ;;  %v26_v19 = vpop.permute.xlu1 %25  }
  0x79   :  { %16 = vst.msk [vmem:[#allocation0] sm:$0x1] %vm15_vm2, %v14_v18  }
  0x7a   :  { %22 = vst.msk [vmem:[#allocation0] sm:$0x1] %vm21_vm3, %v20_v17  }
  0x7b   :  { %28 = vst.msk [vmem:[#allocation0] sm:$0x1] %vm27_vm4, %v26_v19  }
  0x7c   :  { %v32_v20 = vpop.permute.xlu0 %31   ;;  %v38_v21 = vpop.permute.xlu1 %37  }
  0x7d   :  { %34 = vst.msk [vmem:[#allocation0] sm:$0x1] %vm33_vm5, %v32_v20  }
  0x7e   :  { %40 = vst.msk [vmem:[#allocation0] sm:$0x1] %vm39_vm6, %v38_v21  }
  0x80   :  { %v44_v22 = vpop.permute.xlu0 %43   ;;  %v50_v23 = vpop.permute.xlu1 %49  }
  0x81   :  { %46 = vst.msk [vmem:[#allocation0] sm:$0x1] %vm45_vm7, %v44_v22  }
  0x82   :  { %52 = vst.msk [vmem:[#allocation0] sm:$0x1] %vm51_vm8, %v50_v23  }
  0x84   :  { %v56_v24 = vpop.permute.xlu0 %55   ;;  %v62_v25 = vpop.permute.xlu1 %61  }
  0x85   :  { %58 = vst.msk [vmem:[#allocation0] sm:$0x1] %vm57_vm9, %v56_v24  }
  0x86   :  { %64 = vst.msk [vmem:[#allocation0] sm:$0x1] %vm63_vm10, %v62_v25  }
  0x88   :  { %v68_v26 = vpop.permute.xlu0 %67   ;;  %v74_v27 = vpop.permute.xlu1 %73  }
  0x89   :  { %70 = vst.msk [vmem:[#allocation0] sm:$0x1] %vm69_vm11, %v68_v26  }
  0x8a   :  { %76 = vst.msk [vmem:[#allocation0] sm:$0x1] %vm75_vm12, %v74_v27  }
  0x8c   :  { %v80_v28 = vpop.permute.xlu0 %79   ;;  %v86_v29 = vpop.permute.xlu1 %85  }
  0x8d   :  { %82 = vst.msk [vmem:[#allocation0] sm:$0x1] %vm81_vm13, %v80_v28  }
  0x8e   :  { %88 = vst.msk [vmem:[#allocation0] sm:$0x1] %vm87_vm14, %v86_v29  }
  0x90   :  { %v92_v30 = vpop.permute.xlu0 %91  }
  0x91   :  { %94 = vst.msk [vmem:[#allocation0] sm:$0x1] %vm93_vm15, %v92_v30  }
  0x98   :  { %v98_v31 = vld [vmem:[#allocation0] sm:$0x1] }
  0x99   :  { %100 = vst [vmem:[%s208_s1] sm:$0x1] %v98_v31 }

// kernel: same_block_2d.1
= control target key start
LH: loop header
LB: loop body
LE: loop exit
PB: predicated region body
PF: predicated region fallthrough
CT: control target
= control target key end

     0   :  { %s738_s12 = smov 0   ;;  %s847_s0 = inlined_call_operand.vmem [shape: f32[2,16,64], index: 0, kind: input, shape index: {}]   ;;  %s848_s1 = inlined_call_operand.vmem [shape: f32[3,64,128], index: 1, kind: input, shape index: {}]   ;;  %s849_s2 = inlined_call_operand.vmem [shape: f32[1,128], index: 2, kind: input, shape index: {}]   ;;  %s850_s3 = inlined_call_operand.vmem [shape: f32[2,16,128], index: 3, kind: output, shape index: {}]  }
   0x1 LB: > { %s527_s13 = sadd.s32 4294967295, %s716_s12   ;;  %p531_p0 = scmp.ge.s32.totalorder %s716_s12, 1  ;;  %s716_s12 = sphi %s738_s12, %s13_s12  }
   0x2   : > { %p137_p1 = scmp.lt.s32.totalorder %s716_s12, 3 }
   0x4   : > { %p138_p2 = pnand %p531_p0, %p137_p1 }
   0x5   : > { %v181_v0 = vld [vmem:[%s848_s1] sm:$0xff] (!%p138_p2)  ;;  %v182_v1 = vld [vmem:[%s848_s1 + $0x8] sm:$0xff] (!%p138_p2)  ;;  %v183_v2 = vld [vmem:[%s848_s1 + $0x10] sm:$0xff] (!%p138_p2)  ;;  %p161_p3 = scmp.lt.s32.totalorder (!%p138_p2), %s527_s13, 1  ;;  %vm175_vm0 = vcmask (!%p138_p2), 1040384   ;;  %vm198_vm1 = vcmask (!%p138_p2), 523264  }
   0x6   : > { %141 = sbr.rel (%p138_p2) target bundleno = 261 (0x105), region = 32  ;;  %v666_v3 = vpack.c.bf16 (!%p138_p2), %v182_v1, %v181_v0  ;;  %v184_v4 = vld [vmem:[%s848_s1 + $0x18] sm:$0xff] (!%p138_p2)  ;;  %v185_v6 = vld [vmem:[%s848_s1 + $0x20] sm:$0xff] (!%p138_p2)  ;;  %v186_v7 = vld [vmem:[%s848_s1 + $0x28] sm:$0xff] (!%p138_p2)  ;;  %vm358_vm2 = vcmask (!%p138_p2), 1046528  }
   0x7   : > { %v670_v5 = vpack.c.bf16 (!%p138_p2), %v184_v4, %v183_v2  ;;  %v536_v8 = vld [vmem:[%s848_s1 + $0x40] sm:$0xff] (!%p138_p2)  ;;  %v537_v9 = vld [vmem:[%s848_s1 + $0x48] sm:$0xff] (!%p138_p2)  ;;  %v538_v11 = vld [vmem:[%s848_s1 + $0x50] sm:$0xff] (!%p138_p2)  ;;  %v674_v13 = vpack.c.bf16 (!%p138_p2), %v186_v7, %v185_v6 }
   0x8   : > { %667 = vmatprep.subr.bf16.mxu0 (!%p138_p2), %v666_v3  ;;  %v650_v10 = vpack.c.bf16 (!%p138_p2), %v537_v9, %v536_v8  ;;  %v539_v12 = vld [vmem:[%s848_s1 + $0x58] sm:$0xff] (!%p138_p2)  ;;  %v540_v15 = vld [vmem:[%s848_s1 + $0x60] sm:$0xff] (!%p138_p2)  ;;  %v541_v16 = vld [vmem:[%s848_s1 + $0x68] sm:$0xff] (!%p138_p2) }
   0x9   : > { %669 = vmatpush3.bf16.msra.mxu0 (!%p138_p2), %v666_v3  ;;  %v654_v14 = vpack.c.bf16 (!%p138_p2), %v539_v12, %v538_v11  ;;  %v187_v17 = vld [vmem:[%s848_s1 + $0x30] sm:$0xff] (!%p138_p2)  ;;  %v188_v18 = vld [vmem:[%s848_s1 + $0x38] sm:$0xff] (!%p138_p2)  ;;  %v658_v21 = vpack.c.bf16 (!%p138_p2), %v541_v16, %v540_v15  ;;  %v548_v27 = vld [vmem:[%s848_s1 + $0x80] sm:$0xff] (!%p138_p2) }
   0xa   : > { %671 = vmatprep.subr.bf16.mxu0 (!%p138_p2), %v670_v5  ;;  %651 = vmatprep.subr.bf16.mxu1 (!%p138_p2), %v650_v10  ;;  %v678_v22 = vpack.c.bf16 (!%p138_p2), %v188_v18, %v187_v17  ;;  %v542_v25 = vld [vmem:[%s848_s1 + $0x70] sm:$0xff] (!%p138_p2)  ;;  %v543_v26 = vld [vmem:[%s848_s1 + $0x78] sm:$0xff] (!%p138_p2)  ;;  %v549_v28 = vld [vmem:[%s848_s1 + $0x88] sm:$0xff] (!%p138_p2) }
   0xb   : > { %653 = vmatpush3.bf16.msra.mxu1 (!%p138_p2), %v650_v10  ;;  %v662_v30 = vpack.c.bf16 (!%p138_p2), %v543_v26, %v542_v25  ;;  %v682_v32 = vpack.c.bf16 (!%p138_p2), %v549_v28, %v548_v27  ;;  %v550_v34 = vld [vmem:[%s848_s1 + $0x90] sm:$0xff] (!%p138_p2)  ;;  %v551_v35 = vld [vmem:[%s848_s1 + $0x98] sm:$0xff] (!%p138_p2)  ;;  %v552_v39 = vld [vmem:[%s848_s1 + $0xa0] sm:$0xff] (!%p138_p2) }
   0xc   : > { %655 = vmatprep.subr.bf16.mxu1 (!%p138_p2), %v654_v14  ;;  %v686_v37 = vpack.c.bf16 (!%p138_p2), %v551_v35, %v550_v34  ;;  %v553_v40 = vld [vmem:[%s848_s1 + $0xa8] sm:$0xff] (!%p138_p2)  ;;  %v554_v42 = vld [vmem:[%s848_s1 + $0xb0] sm:$0xff] (!%p138_p2)  ;;  %v555_v43 = vld [vmem:[%s848_s1 + $0xb8] sm:$0xff] (!%p138_p2) }
   0xd   : > { %s852_s13 = smov (!%p161_p3, %s527_s13), 1  ;;  %673 = vmatpush3.bf16.msra.mxu0 %v670_v5  ;;  %v690_v41 = vpack.c.bf16 %v553_v40, %v552_v39  ;;  %v694_v44 = vpack.c.bf16 %v555_v43, %v554_v42  ;;  %v558_v49 = vld [vmem:[%s849_s2] ss:$0 sm:$0xff] }
   0xe   : > { %s561_s30 = sshll.u32 %s852_s13, 4  ;;  %675 = vmatprep.subr.bf16.mxu0 %v674_v13 }
   0xf   : > { %s165_s10 = scalar_lea.vmem %s847_s0, %s561_s30  ;;  %657 = vmatpush3.bf16.msra.mxu1 %v654_v14  ;;  %s170_s21 = scalar_lea.vmem %s850_s3, %s561_s30 }
  0x10   : > { %v171_v19 = vld [vmem:[%s165_s10] sm:$0xff]  ;;  %v172_v23 = vld [vmem:[%s165_s10 + $0x8] sm:$0xff]  ;;  %659 = vmatprep.subr.bf16.mxu1 %v658_v21 }
  0x11   : > { %v176_v20 = vrot.slane %v171_v19, 7  ;;  %609 = vmatprep.mubr.msk.f32.mxu1 %vm198_vm1, %v171_v19  ;;  %677 = vmatpush3.bf16.msra.mxu0 %v674_v13  ;;  %v177_v29 = vrot.slane %v172_v23, 7  ;;  %v359_v31 = vrot.slane %v171_v19, 1  ;;  %v360_v33 = vrot.slane %v172_v23, 1 }
  0x12   : > { %679 = vmatprep.subr.bf16.mxu0 %v678_v22 }
  0x13   : > { %v180_v24 = vsel %vm175_vm0, 0.0, %v176_v20  ;;  %661 = vmatpush3.bf16.msra.mxu1 %v658_v21  ;;  %v178_v36 = vsel %vm175_vm0, %v176_v20, %v177_v29  ;;  %v361_v38 = vsel %vm358_vm2, %v359_v31, %v360_v33  ;;  %v363_v45 = vsel %vm358_vm2, %v360_v33, 0.0 }
  0x14   : > { %628 = vmatprep.mubr.msk.f32.mxu0 %vm198_vm1, %v180_v24  ;;  %663 = vmatprep.subr.bf16.mxu1 %v662_v30 }
  0x15   : > { %681 = vmatpush3.bf16.msra.mxu0 %v678_v22 }
  0x16   : > { %683 = vmatprep.subr.bf16.mxu0 %v682_v32 }
  0x17   : > { %665 = vmatpush3.bf16.msra.mxu1 %v662_v30 }
  0x18   : > { %629 = vmatmul.mubr.msk.f32.vlgmr.msra.gmra.mrb[0].mxu0 %vm198_vm1, %v178_v36 }
  0x19   : > { %685 = vmatpush3.bf16.msra.mxu0 %v682_v32  ;;  %647 = vmatprep.mubr.msk.f32.mxu0 %vm198_vm1, %v361_v38 }
  0x1a   : > { %687 = vmatprep.subr.bf16.mxu0 %v686_v37  ;;  %610 = vmatmul.mubr.msk.f32.vlgmr.msra.gmra.mrb[0].mxu1 %vm198_vm1, %v172_v23 }
  0x1d   : > { %689 = vmatpush3.bf16.msra.mxu0 %v686_v37 }
  0x1e   : > { %691 = vmatprep.subr.bf16.mxu0 %v690_v41 }
  0x21   : > { %693 = vmatpush3.bf16.msra.mxu0 %v690_v41 }
  0x22   : > { %695 = vmatprep.subr.bf16.mxu0 %v694_v44 }
  0x25   : > { %697 = vmatpush3.bf16.msra.mxu0 %v694_v44 }
  0x28   : > { %648 = vmatmul.mubr.msk.f32.vlgmr.msra.gmra.mrb[0].mxu0 %vm198_vm1, %v363_v45 }
  0xed   : > { %v611_v46 = vpop.f32.mrb[0].mxu1 }
  0xee   : > { %v269_v47 = vpop.f32.mrb[1].mxu1 }
  0xfb   : > { %v649_v48 = vpop.f32.mrb[0].mxu0 }
  0xfc   : > { %v698_v50 = vadd.f32 %v649_v48, %v611_v46  ;;  %v444_v51 = vpop.f32.mrb[1].mxu0 }
  0xfd   : > { %v699_v52 = vadd.f32 %v444_v51, %v269_v47 }
  0xfe   : > { %v463_v53 = vadd.f32 %v698_v50, %v558_v49 }
  0xff   : > { %v462_v54 = vadd.f32 %v699_v52, %v558_v49 }
 0x100   : > { %vm465_vm3 = vcmp.gt.f32.partialorder %v463_v53, 0.0  ;;  %v467_v55 = vmul.f32 0.2, %v463_v53 }
 0x101   : > { %vm464_vm4 = vcmp.gt.f32.partialorder %v462_v54, 0.0  ;;  %v466_v56 = vmul.f32 0.2, %v462_v54 }
 0x102   : > { %v469_v57 = vsel %vm465_vm3, %v463_v53, %v467_v55 }
 0x103   : > { %471 = vst [vmem:[%s170_s21 + $0x8] sm:$0xff] %v469_v57  ;;  %v468_v58 = vsel %vm464_vm4, %v462_v54, %v466_v56 }
 0x104   : > { %470 = vst [vmem:[%s170_s21] sm:$0xff] %v468_v58 }
 0x105 PF: > { %s13_s12 = sadd.s32 1, %s716_s12  }
 0x106   : > { %p10_p4 = scmp.ge.s32.totalorder %s13_s12, 4  }
 0x108   :  { %12 = sbr.rel (!%p10_p4) target bundleno = 1 (0x1), region = 64 }

</bundles_post_ra>
